<compile_context>
chip_gen: v7x
topology: tpu7x:2x2x1
jax: 0.10.0
libtpu: 0.0.40
codegen_flags: <defaults>
</compile_context>

<pallas_src>
import jax
import jax.numpy as jnp
from jax.experimental import pallas as pl
from jax.experimental.pallas import tpu as pltpu

LANES = 128          # vreg lane width
SUBLANES = 8         # f32 vreg sublane width
MAX_TILE_M = 1024    # rows per block: (1024, 128) f32 = 512 KiB/block
_SMALL_N = 1024      # below this, plain XLA beats kernel launch overhead


def _round_up(x: int, m: int) -> int:
    return ((x + m - 1) // m) * m


def _pinn_kernel(coeff_ref, t_ref, x_ref, y_ref):
    # coeff_ref: SMEM (2,)        -> [c1, c2]
    # t_ref:     VMEM (tile_m, 128)   lane-dense t slab
    # x_ref:     VMEM (tile_m, 128)   x(t) =  c1*e + c2*e^3
    # y_ref:     VMEM (tile_m, 128)   y(t) = -c1*e + c2*e^3
    c1 = coeff_ref[0]
    c2 = coeff_ref[1]

    t = t_ref[...]
    e = jnp.exp(-t)                 # one EUP transcendental per element
    e3 = e * e * e                  # exp(-3t) on the VPU (EUP pressure halved)

    s = c2 * e3
    d = c1 * e
    x_ref[...] = s + d              # unmasked, lane-dense stores
    y_ref[...] = s - d


def _pinn_jax(t, c1, c2):
    """Plain-JAX path (tiny-N fast path and reference)."""
    t = t.astype(jnp.float32)
    exp_t = jnp.exp(-t)
    exp_3t = jnp.exp(-3.0 * t)
    x = c1 * exp_t + c2 * exp_3t
    y = -c1 * exp_t + c2 * exp_3t
    return jnp.concatenate([x, y], axis=1)


def _pick_tile_m(m: int) -> int:
    if m <= SUBLANES:
        return m                                   # single whole-array block
    # >= 2 blocks so v7x megacore can split the row axis; cap per-block VMEM.
    return min(MAX_TILE_M, _round_up(-(-m // 2), SUBLANES))


def pinn_forward(t: jax.Array, c1, c2, *, force_pallas: bool = False) -> jax.Array:
    """Pallas implementation of PINN.forward. t: (N, 1) float -> (N, 2)."""
    assert t.ndim == 2 and t.shape[1] == 1, "expected t of shape (N, 1)"
    n = t.shape[0]

    c1 = jnp.asarray(c1, jnp.float32).reshape(())
    c2 = jnp.asarray(c2, jnp.float32).reshape(())

    # Tiny N: pallas_call launch overhead dominates -> plain XLA.
    if n < _SMALL_N and not force_pallas:
        return _pinn_jax(t, c1, c2)

    t_flat = t.astype(jnp.float32).reshape(-1)     # (N,)

    # Lane-dense slab (m, 128).  Pad only when N is not a multiple of 128.
    m = -(-n // LANES)
    if n == m * LANES:
        t_slab = t_flat.reshape(m, LANES)          # free-ish reshape, no pad
    else:
        m = _round_up(m, SUBLANES)
        t_slab = jnp.pad(t_flat, (0, m * LANES - n)).reshape(m, LANES)

    tile_m = _pick_tile_m(m)
    grid = (-(-m // tile_m),)                      # ragged last block is OK

    coeffs = jnp.stack([c1, c2])                   # (2,) f32 SMEM operand

    x_slab, y_slab = pl.pallas_call(
        _pinn_kernel,
        out_shape=(
            jax.ShapeDtypeStruct((m, LANES), jnp.float32),
            jax.ShapeDtypeStruct((m, LANES), jnp.float32),
        ),
        grid=grid,
        in_specs=[
            pl.BlockSpec(memory_space=pltpu.MemorySpace.SMEM),   # coeffs (2,)
            pl.BlockSpec((tile_m, LANES), lambda i: (i, 0)),     # t slab
        ],
        out_specs=[
            pl.BlockSpec((tile_m, LANES), lambda i: (i, 0)),     # x slab
            pl.BlockSpec((tile_m, LANES), lambda i: (i, 0)),     # y slab
        ],
        compiler_params=pltpu.CompilerParams(
            dimension_semantics=("parallel",),
        ),
    )(coeffs, t_slab)

    # Wrapper-side layout plumbing back to the PyTorch (N, 2) layout.
    x = x_slab.reshape(-1)[:n]
    y = y_slab.reshape(-1)[:n]
    return jnp.stack([x, y], axis=1)               # col 0 = x, col 1 = y


if __name__ == "__main__":
    # PyTorch __init__ sets both coefficients to 1.0.
    c1 = jnp.float32(1.0)
    c2 = jnp.float32(1.0)

    key = jax.random.PRNGKey(0)

    # exp(-t)**3 vs exp(-3t) differs by a couple of ulps -> slightly relaxed tol.
    def check(out, t):
        ref = _pinn_jax(t, c1, c2)
        assert out.shape == ref.shape
        assert jnp.allclose(out, ref, atol=1e-6, rtol=1e-5), "mismatch vs reference"

    # 1) Tiny N -> plain-JAX fast path.
    t_small = jax.random.uniform(key, (256, 1), jnp.float32, minval=0.0, maxval=2.0)
    out_small = jax.block_until_ready(pinn_forward(t_small, c1, c2))
    check(out_small, t_small)

    # 2) Small ragged N forced through the Pallas kernel (padded single block).
    t_ragged = jax.random.uniform(key, (300, 1), jnp.float32, minval=0.0, maxval=2.0)
    out_ragged = jax.block_until_ready(
        pinn_forward(t_ragged, c1, c2, force_pallas=True))
    check(out_ragged, t_ragged)

    # 3) N multiple of 128 but rows not a multiple of the tile (ragged last block).
    t_mid = jax.random.uniform(key, (1280, 1), jnp.float32, minval=0.0, maxval=2.0)
    out_mid = jax.block_until_ready(pinn_forward(t_mid, c1, c2))
    check(out_mid, t_mid)

    # 4) Clean multi-block case (2 blocks -> exercises the parallel row grid).
    t_big = jax.random.uniform(key, (2048, 1), jnp.float32, minval=0.0, maxval=2.0)
    out_big = jax.block_until_ready(pinn_forward(t_big, c1, c2))
    check(out_big, t_big)

    print("KERNEL_OK")
</pallas_src>

<mosaic_0001>
module attributes {stable_mosaic.version = 11 : i64} {
  func.func @_pinn_kernel(%arg0: i32, %arg1: memref<2xf32, #tpu.memory_space<smem>>, %arg2: memref<8x128xf32, #tpu.memory_space<vmem>>, %arg3: memref<8x128xf32, #tpu.memory_space<vmem>>, %arg4: memref<8x128xf32, #tpu.memory_space<vmem>>) attributes {dimension_semantics = [#tpu.dimension_semantics<parallel>], iteration_bounds = array<i64: 1>, scalar_prefetch = 0 : i64, scratch_operands = 0 : i64, tpu.core_type = #tpu.core_type<tc>, window_params = [{transform_indices = @transform_0, window_bounds = array<i64: 2>}, {transform_indices = @transform_1, window_bounds = array<i64: 8, 128>}, {transform_indices = @transform_2, window_bounds = array<i64: 8, 128>}, {transform_indices = @transform_3, window_bounds = array<i64: 8, 128>}]} {
    %c0 = arith.constant 0 : index
    %0 = memref.load %arg1[%c0] : memref<2xf32, #tpu.memory_space<smem>>
    %c1 = arith.constant 1 : index
    %1 = memref.load %arg1[%c1] : memref<2xf32, #tpu.memory_space<smem>>
    %c0_0 = arith.constant 0 : index
    %c0_1 = arith.constant 0 : index
    %2 = vector.load %arg2[%c0_0, %c0_1] : memref<8x128xf32, #tpu.memory_space<vmem>>, vector<8x128xf32>
    %cst = arith.constant 0.000000e+00 : f32
    %3 = vector.broadcast %cst : f32 to vector<8x128xf32>
    %4 = arith.subf %3, %2 : vector<8x128xf32>
    %5 = math.exp %4 : vector<8x128xf32>
    %6 = arith.mulf %5, %5 : vector<8x128xf32>
    %7 = arith.mulf %6, %5 : vector<8x128xf32>
    %8 = vector.broadcast %1 : f32 to vector<8x128xf32>
    %9 = arith.mulf %8, %7 : vector<8x128xf32>
    %10 = vector.broadcast %0 : f32 to vector<8x128xf32>
    %11 = arith.mulf %10, %5 : vector<8x128xf32>
    %12 = arith.addf %9, %11 : vector<8x128xf32>
    %c0_2 = arith.constant 0 : index
    %c0_3 = arith.constant 0 : index
    %13 = vector.load %arg3[%c0_2, %c0_3] : memref<8x128xf32, #tpu.memory_space<vmem>>, vector<8x128xf32>
    tpu.vector_store %arg3[%c0_2, %c0_3], %12 {strides = array<i32>} : memref<8x128xf32, #tpu.memory_space<vmem>>, vector<8x128xf32>,
    %14 = arith.subf %9, %11 : vector<8x128xf32>
    %c0_4 = arith.constant 0 : index
    %c0_5 = arith.constant 0 : index
    %15 = vector.load %arg4[%c0_4, %c0_5] : memref<8x128xf32, #tpu.memory_space<vmem>>, vector<8x128xf32>
    tpu.vector_store %arg4[%c0_4, %c0_5], %14 {strides = array<i32>} : memref<8x128xf32, #tpu.memory_space<vmem>>, vector<8x128xf32>,
    return
  }
  func.func @transform_0(%arg0: i32) -> i32 {
    %c0_i32 = arith.constant 0 : i32
    %c0_i32_0 = arith.constant 0 : i32
    return %c0_i32 : i32
  }
  func.func @transform_1(%arg0: i32) -> (i32, i32) {
    %c0_i32 = arith.constant 0 : i32
    %c0_i32_0 = arith.constant 0 : i32
    return %arg0, %c0_i32 : i32, i32
  }
  func.func @transform_2(%arg0: i32) -> (i32, i32) {
    %c0_i32 = arith.constant 0 : i32
    %c0_i32_0 = arith.constant 0 : i32
    return %arg0, %c0_i32 : i32, i32
  }
  func.func @transform_3(%arg0: i32) -> (i32, i32) {
    %c0_i32 = arith.constant 0 : i32
    %c0_i32_0 = arith.constant 0 : i32
    return %arg0, %c0_i32 : i32, i32
  }
}

</mosaic_0001>

<bundles_post_ra>
// kernel: tpu_custom_call.1
= control target key start
LH: loop header
LB: loop body
LE: loop exit
PB: predicated region body
PF: predicated region fallthrough
CT: control target
= control target key end

     0   :  { %9 = vsyncpa [#allocation5], 0  ;;  %s247_s0 = inlined_call_operand.hbm [shape: f32[2], index: 0, kind: input, shape index: {}]   ;;  %s248_s1 = inlined_call_operand.hbm [shape: f32[8,128], index: 1, kind: input, shape index: {}]   ;;  %s249_s2 = inlined_call_operand.hbm [shape: f32[8,128], index: 2, kind: output, shape index: {0}]   ;;  %s250_s3 = inlined_call_operand.hbm [shape: f32[8,128], index: 3, kind: output, shape index: {1}]  }
   0x1   :  { %10 = vsyncpa [#allocation3], 0 }
   0x2   :  { %11 = vsyncpa [#allocation4], 0 }
   0x3   :  { %12 = vsyncpa [#allocation9], 0  ;;  %s91_s14 = scalar_lea.hbm %s247_s0, 16 }
   0x4   :  { %p92_p0 = scmp.ne.s32.totalorder %s247_s0, %s91_s14  ;;  %p95_p1 = scmp.lt.u32.totalorder %s91_s14, %s247_s0 }
   0x6   :  { %p97_p2 = pnand %p95_p1, %p92_p0 }
   0x8   :  { %100 = shalt.err (!%p97_p2)
}
   0x9   :  { %s175_s19 = smov [#allocation2]   ;;  %s176_s22 = smov [#allocation6]  }
   0xa   :  { %20 = dma.hbm_to_smem %s247_s0, 16, %s175_s19, [#allocation5]  }
   0xb   :  { %s27_s23 = sshll.u32 %s176_s22, 4  ;;  %s101_s26 = scalar_lea.hbm %s248_s1, 128  ;;  %s28_s23 = int_to_ptr.vmem [resolvable:$true] %s27_s23 }
   0xc   :  { %p102_p3 = scmp.ne.s32.totalorder %s248_s1, %s101_s26  ;;  %p105_p4 = scmp.lt.u32.totalorder %s101_s26, %s248_s1 }
   0xe   :  { %p107_p5 = pnand %p105_p4, %p102_p3 }
  0x10   :  { %110 = shalt.err (!%p107_p5)
}
  0x11   :  { %s111_s4 = scalar_lea.vmem %s28_s23, 128  ;;  %p116_p7 = scmp.lt.s32.totalorder %s28_s23, %s28_s23 }
  0x12   :  { %p112_p6 = scmp.ne.s32.totalorder %s28_s23, %s111_s4  ;;  %p117_p8 = scmp.lt.s32.totalorder %s111_s4, %s111_s4 }
  0x14   :  { %p118_p9 = por %p117_p8, %p116_p7 }
  0x16   :  { %p119_p10 = pnand %p118_p9, %p112_p6 }
  0x18   :  { %122 = shalt.err (!%p119_p10)
}
  0x19   :  { %30 = dma.hbm_to_vmem [thread:$0]  %s248_s1, 128, %s28_s23, [#allocation3]  }
  0x1a   :  { %167 = dma.done.wait [#allocation5], 16  }
  0x1b   :  { %168 = vsyncadd [#allocation5], 4294967280 }
  0x1c   :  { %169 = dma.done.wait [#allocation3], 128  }
  0x1d   :  { %170 = vsyncadd [#allocation3], 4294967168 }
  0x1e   :  { %37 = sfence }
  0x1f   :  { %v40_v0 = vld [vmem:[#allocation6] sm:$0xff]  ;;  %s38_s6 = sld [smem:[#allocation2]]  ;;  %s84_s7 = sld [smem:[#allocation2 + $0x1]] }
  0x20   :  { %v41_v1 = vsub.f32 0.0, %v40_v0  ;;  %s177_s8 = smov [#allocation7]   ;;  %s178_s1 = smov [#allocation8]  }
  0x21   :  { %s60_s9 = sshll.u32 %s177_s8, 4  ;;  %s70_s10 = sshll.u32 %s178_s1, 4  ;;  %s61_s9 = int_to_ptr.vmem [resolvable:$true] %s60_s9  ;;  %s71_s10 = int_to_ptr.vmem [resolvable:$true] %s70_s10 }
  0x22   :  { %v42_v2 = vmul.f32 1.442695, %v41_v1  ;;  %s123_s11 = scalar_lea.vmem %s61_s9, 128  ;;  %p128_p12 = scmp.lt.s32.totalorder %s61_s9, %s61_s9 }
  0x23   :  { %p124_p11 = scmp.ne.s32.totalorder %s61_s9, %s123_s11  ;;  %p129_p13 = scmp.lt.s32.totalorder %s123_s11, %s123_s11 }
  0x24   :  { %89 = vpow2.f32 %v42_v2 }
  0x25   :  { %v48_v4 = vstv %s38_s6  ;;  %v46_v6 = vstv %s84_s7  ;;  %p130_p0 = por %p129_p13, %p128_p12 }
  0x27   :  { %p131_p1 = pnand %p130_p0, %p124_p11 }
  0x2e   :  { %v90_v3 = vpop.eup %89 }
  0x2f   :  { %v44_v5 = vmul.f32 %v90_v3, %v90_v3  ;;  %v49_v8 = vmul.f32 %v90_v3, %v48_v4 }
  0x31   :  { %v45_v7 = vmul.f32 %v90_v3, %v44_v5 }
  0x33   :  { %v47_v9 = vmul.f32 %v46_v6, %v45_v7 }
  0x35   :  { %v50_v10 = vadd.f32 %v49_v8, %v47_v9  ;;  %v52_v11 = vsub.f32 %v47_v9, %v49_v8 }
  0x37   :  { %51 = vst [vmem:[#allocation7] sm:$0xff] %v50_v10  ;;  %53 = vst [vmem:[#allocation8] sm:$0xff] %v52_v11 }
  0x38   :  { %134 = shalt.err (!%p131_p1)
}
  0x39   :  { %s135_s14 = scalar_lea.hbm %s249_s2, 128 }
  0x3a   :  { %p136_p2 = scmp.ne.s32.totalorder %s249_s2, %s135_s14  ;;  %p139_p3 = scmp.lt.u32.totalorder %s135_s14, %s249_s2 }
  0x3c   :  { %p141_p4 = pnand %p139_p3, %p136_p2 }
  0x3e   :  { %144 = shalt.err (!%p141_p4)
}
  0x3f   :  { %63 = dma.vmem_to_hbm [thread:$0]  %s61_s9, 128, %s249_s2, [#allocation4]  }
  0x40   :  { %s145_s21 = scalar_lea.vmem %s71_s10, 128  ;;  %p150_p6 = scmp.lt.s32.totalorder %s71_s10, %s71_s10 }
  0x41   :  { %p146_p5 = scmp.ne.s32.totalorder %s71_s10, %s145_s21  ;;  %p151_p7 = scmp.lt.s32.totalorder %s145_s21, %s145_s21 }
  0x43   :  { %p152_p8 = por %p151_p7, %p150_p6 }
  0x45   :  { %p153_p9 = pnand %p152_p8, %p146_p5 }
  0x47   :  { %156 = shalt.err (!%p153_p9)
}
  0x48   :  { %s157_s24 = scalar_lea.hbm %s250_s3, 128 }
  0x49   :  { %p158_p10 = scmp.ne.s32.totalorder %s250_s3, %s157_s24  ;;  %p161_p11 = scmp.lt.u32.totalorder %s157_s24, %s250_s3 }
  0x4b   :  { %p163_p12 = pnand %p161_p11, %p158_p10 }
  0x4d   :  { %166 = shalt.err (!%p163_p12)
}
  0x4e   :  { %73 = dma.vmem_to_hbm [thread:$0]  %s71_s10, 128, %s250_s3, [#allocation9]  }
  0x4f   :  { %171 = dma.done.wait [#allocation4], 128  }
  0x50   :  { %172 = vsyncadd [#allocation4], 4294967168 }
  0x51   :  { %173 = dma.done.wait [#allocation9], 128  }
  0x52   :  { %174 = vsyncadd [#allocation9], 4294967168 }
  0x53   :  { %80 = vsyncpa [#allocation3], 1 }
  0x54   :  { %81 = vsyncpa [#allocation4], 1 }
  0x55   :  { %82 = vsyncpa [#allocation9], 1 }
  0x56   :  { %83 = vsyncpa [#allocation5], 1 }

</bundles_post_ra>
